<compile_context>
chip_gen: v7x
topology: tpu7x:2x2x1
jax: 0.10.0
libtpu: 0.0.40
codegen_flags: <defaults>
</compile_context>

<pallas_src>
from functools import partial

import jax
import jax.numpy as jnp
import numpy as np
from jax import lax
from jax.experimental import pallas as pl
from jax.experimental.pallas import tpu as pltpu

_VMEM_LIMIT_BYTES = 64 * 1024 * 1024  # safe on v5e/v6e (128 MiB) and v7x (64 MiB)


def _round_up(x, m):
    return ((x + m - 1) // m) * m


# ---------------------------------------------------------------------------
# Kernel 1: tiled dense layer  y = x @ w + b
# Grid (M//bm, N//bn, K//bk); f32 accumulator in VMEM, bias folded into init.
# ---------------------------------------------------------------------------
def _matmul_kernel(x_ref, w_ref, b_ref, o_ref, acc_ref):
    # Initialize the accumulator with the broadcast bias (removes a full-tile
    # VPU add from the flush step).
    @pl.when(pl.program_id(2) == 0)
    def _():
        acc_ref[...] = jnp.broadcast_to(b_ref[...], acc_ref.shape)

    acc_ref[...] += jnp.dot(
        x_ref[...], w_ref[...], preferred_element_type=jnp.float32
    )

    @pl.when(pl.program_id(2) == pl.num_programs(2) - 1)
    def _():
        o_ref[...] = acc_ref[...].astype(o_ref.dtype)


def linear(x, w, b, *, matmul_dtype=jnp.float32, out_dtype=jnp.float32,
           tm=512, tn=512, tk=512):
    """x: (M, K), w: (K, N), b: (N,) -> (M, N) in out_dtype."""
    M, K = x.shape
    N = w.shape[1]
    x = x.astype(matmul_dtype)
    w = w.astype(matmul_dtype)
    b2 = b.reshape(1, N).astype(jnp.float32)

    if K <= tk:
        bk = K                                  # full-K block ("== full dim" rule)
    else:
        # Zero-pad ragged K up to a multiple of tk (exact for matmul) so the
        # K axis always pipelines in tk slabs instead of one huge VMEM strip.
        bk = tk
        Kp = _round_up(K, tk)
        if Kp != K:
            x = jnp.pad(x, ((0, 0), (0, Kp - K)))
            w = jnp.pad(w, ((0, Kp - K), (0, 0)))
        K = Kp

    bm = M if M <= tm else tm
    bn = N if N <= tn else tn
    grid = (pl.cdiv(M, bm), pl.cdiv(N, bn), K // bk)

    return pl.pallas_call(
        _matmul_kernel,
        out_shape=jax.ShapeDtypeStruct((M, N), out_dtype),
        grid=grid,
        in_specs=[
            pl.BlockSpec((bm, bk), lambda i, j, k: (i, k)),
            pl.BlockSpec((bk, bn), lambda i, j, k: (k, j)),
            pl.BlockSpec((1, bn), lambda i, j, k: (0, j)),
        ],
        out_specs=pl.BlockSpec((bm, bn), lambda i, j, k: (i, j)),
        scratch_shapes=[pltpu.VMEM((bm, bn), jnp.float32)],
        compiler_params=pltpu.CompilerParams(
            dimension_semantics=("parallel", "parallel", "arbitrary"),
            vmem_limit_bytes=_VMEM_LIMIT_BYTES,
        ),
    )(x, w, b2)


# ---------------------------------------------------------------------------
# Kernel 2: LSTM recurrence, batch-blocked (parallel) x time-chunked (arbitrary)
# Gate order (i, f, o, g): one wide sigmoid over [:, :3H], one tanh over
# [:, 3H:]. h/c state lives in VMEM scratch across the time chunks of each
# batch block; re-seeded from h0/c0 at chunk==0; final h/c written at the
# last chunk. xg is sliced per time step from the ref (no big live slab).
# ---------------------------------------------------------------------------
def _lstm_kernel(xg_ref, whh_ref, h0_ref, c0_ref,
                 out_ref, hn_ref, cn_ref,
                 h_sc, c_sc, *, seq_len, seq_len_padded):
    chunk = pl.program_id(1)
    tc = out_ref.shape[1]
    Hp = h_sc.shape[-1]
    need_mask = seq_len_padded != seq_len      # static Python bool

    @pl.when(chunk == 0)
    def _():
        h_sc[...] = h0_ref[...]
        c_sc[...] = c0_ref[...]

    w_hh = whh_ref[...]                        # (Hp, 4Hp), resident weight
    h = h_sc[...]
    c = c_sc[...]

    # Fully unrolled over the (small, static) time chunk.
    for s in range(tc):
        gates = xg_ref[:, s, :].astype(jnp.float32) + jnp.dot(
            h.astype(w_hh.dtype), w_hh, preferred_element_type=jnp.float32
        )                                       # (Bb, 4Hp), order (i, f, o, g)
        act = jax.nn.sigmoid(gates[:, :3 * Hp])  # i | f | o in one wide EUP pass
        g = jnp.tanh(gates[:, 3 * Hp:])
        i = act[:, :Hp]
        f = act[:, Hp:2 * Hp]
        o = act[:, 2 * Hp:]

        c_new = f * c + i * g
        h_new = o * jnp.tanh(c_new)
        if need_mask:
            valid = (chunk * tc + s) < seq_len   # mask padded tail timesteps
            c = jnp.where(valid, c_new, c)
            h = jnp.where(valid, h_new, h)
        else:
            c, h = c_new, h_new
        # TODO(synk): on v5e, group 8 consecutive steps into one (Bb,8,Hp)
        # store if the vst slot saturates (per-step stores are sublane-masked).
        out_ref[:, s, :] = h_new.astype(out_ref.dtype)

    h_sc[...] = h
    c_sc[...] = c

    @pl.when(chunk == pl.num_programs(1) - 1)
    def _():
        hn_ref[...] = h
        cn_ref[...] = c


def _pick_batch_block(Bp):
    """Batch rows per block: >=8 sublanes, and >=2 blocks when the batch allows
    (so the 'parallel' batch axis can shard across v7x TensorCores)."""
    if Bp <= 8:
        return Bp
    for bb in range(Bp // 2, 7, -1):
        if Bp % bb == 0 and bb % 8 == 0:
            return bb
    return Bp


def lstm_recurrence(xg, w_hh_t, h0, c0, *, time_chunk_target=16):
    """xg: (Bp, T, 4Hp) input gate contributions (biases folded, order i|f|o|g),
       w_hh_t: (Hp, 4Hp), h0/c0: (Bp, Hp).
       Returns (out (Bp, T, Hp) f32, h_next (Bp, Hp), c_next (Bp, Hp))."""
    Bp, T, G = xg.shape
    Hp = G // 4

    # Time chunking: pad T up to n_chunks * Tc and mask the tail in-kernel
    # (instead of hunting for a divisor -> Tc=1 degeneration for prime T).
    n_chunks = max(1, -(-T // time_chunk_target))
    Tc = -(-T // n_chunks)
    T_pad = n_chunks * Tc
    if T_pad != T:
        xg = jnp.pad(xg, ((0, 0), (0, T_pad - T), (0, 0)))

    Bb = _pick_batch_block(Bp)
    kernel = partial(_lstm_kernel, seq_len=T, seq_len_padded=T_pad)

    out_shapes = (
        jax.ShapeDtypeStruct((Bp, T_pad, Hp), jnp.float32),
        jax.ShapeDtypeStruct((Bp, Hp), jnp.float32),
        jax.ShapeDtypeStruct((Bp, Hp), jnp.float32),
    )
    out, h_next, c_next = pl.pallas_call(
        kernel,
        out_shape=out_shapes,
        grid=(Bp // Bb, T_pad // Tc),
        in_specs=[
            pl.BlockSpec((Bb, Tc, G), lambda b, t: (b, t, 0)),
            pl.BlockSpec((Hp, G), lambda b, t: (0, 0)),
            pl.BlockSpec((Bb, Hp), lambda b, t: (b, 0)),
            pl.BlockSpec((Bb, Hp), lambda b, t: (b, 0)),
        ],
        out_specs=(
            pl.BlockSpec((Bb, Tc, Hp), lambda b, t: (b, t, 0)),
            pl.BlockSpec((Bb, Hp), lambda b, t: (b, 0)),
            pl.BlockSpec((Bb, Hp), lambda b, t: (b, 0)),
        ),
        scratch_shapes=[
            pltpu.VMEM((Bb, Hp), jnp.float32),
            pltpu.VMEM((Bb, Hp), jnp.float32),
        ],
        compiler_params=pltpu.CompilerParams(
            dimension_semantics=("parallel", "arbitrary"),
            vmem_limit_bytes=_VMEM_LIMIT_BYTES,
        ),
    )(xg, w_hh_t, h0, c0)

    if T_pad != T:
        out = out[:, :T, :]
    return out, h_next, c_next


# ---------------------------------------------------------------------------
# Parameter prep + model wrapper (prep in plain JAX, hot paths in Pallas)
# ---------------------------------------------------------------------------
def _prep_lstm_weights(params, Hp):
    """Reorder PyTorch gate blocks (i,f,g,o)->(i,f,o,g), zero-pad each gate and
    the hidden contraction dim to Hp (exact: padded h/c lanes stay 0), and fuse
    fc_in into the input projection."""
    H = params["w_in"].shape[0]
    pad = Hp - H

    def blocks(a):     # split (4H, ...) into PyTorch-order gate blocks
        return {"i": a[:H], "f": a[H:2 * H], "g": a[2 * H:3 * H], "o": a[3 * H:]}

    order = ("i", "f", "o", "g")
    wih = blocks(params["w_ih"])                       # each (H_out, H_in)
    whh = blocks(params["w_hh"])
    bg = blocks(params["b_ih"] + params["b_hh"])       # each (H,)

    # (H_in, 4Hp): per gate, transpose to (in, out) and pad the out dim.
    w_ih_t = jnp.concatenate(
        [jnp.pad(wih[g].T, ((0, 0), (0, pad))) for g in order], axis=1)
    # (Hp, 4Hp): pad both the hidden (in) dim and each gate's out dim.
    w_hh_t = jnp.concatenate(
        [jnp.pad(whh[g].T, ((0, pad), (0, pad))) for g in order], axis=1)
    b_gate = jnp.concatenate([jnp.pad(bg[g], (0, pad)) for g in order])

    # Fuse fc_in:  xg = x @ (w_in.T @ w_ih.T) + (b_in @ w_ih.T + b_ih + b_hh)
    w_x = params["w_in"].T @ w_ih_t                    # (D, 4Hp)
    b_x = params["b_in"] @ w_ih_t + b_gate             # (4Hp,)
    return w_x, b_x, w_hh_t


def init_params(key, input_dim, hidden, vocab):
    ks = jax.random.split(key, 8)
    s_in = 1.0 / np.sqrt(input_dim)
    s_h = 1.0 / np.sqrt(hidden)
    u = lambda k, shape, s: jax.random.uniform(k, shape, jnp.float32, -s, s)
    return {
        "w_in": u(ks[0], (hidden, input_dim), s_in),   # fc_in.weight  (H, D)
        "b_in": u(ks[1], (hidden,), s_in),             # fc_in.bias
        "w_ih": u(ks[2], (4 * hidden, hidden), s_h),   # lstm.weight_ih_l0 (4H, H)
        "w_hh": u(ks[3], (4 * hidden, hidden), s_h),   # lstm.weight_hh_l0 (4H, H)
        "b_ih": u(ks[4], (4 * hidden,), s_h),
        "b_hh": u(ks[5], (4 * hidden,), s_h),
        "w_out": u(ks[6], (vocab, hidden), s_h),       # fc_out.weight (V, H)
        "b_out": u(ks[7], (vocab,), s_h),
    }


def lstm_forward(params, feature, h, c, matmul_dtype=jnp.bfloat16):
    """feature: (B, T, input_dim); h, c: (1, B, hidden).
       Returns (output (B, T, vocab), h_next (1, B, H), c_next (1, B, H))."""
    B, T, D = feature.shape
    H = params["w_in"].shape[0]
    V = params["w_out"].shape[0]

    # Lane/sublane alignment: hidden -> multiple of 128, batch -> multiple of 8.
    Hp = _round_up(H, 128)
    Bp = _round_up(B, 8)

    # Parameter prep (tiny; cache per set of weights in production).
    w_x, b_x, w_hh_t = _prep_lstm_weights(params, Hp)
    w_out_t = jnp.pad(params["w_out"].T, ((0, Hp - H), (0, 0)))   # (Hp, V)

    feat_p = jnp.pad(feature, ((0, Bp - B), (0, 0), (0, 0)))
    h0 = jnp.pad(h[0], ((0, Bp - B), (0, Hp - H)))
    c0 = jnp.pad(c[0], ((0, Bp - B), (0, Hp - H)))

    # xg is the largest intermediate: bf16 storage on the bf16 path halves its
    # HBM traffic and its recurrence double-buffer VMEM footprint.
    xg_dtype = jnp.bfloat16 if matmul_dtype == jnp.bfloat16 else jnp.float32

    # Fused input projection over all timesteps (tiled Pallas matmul).
    xg = linear(feat_p.reshape(Bp * T, D), w_x, b_x,
                matmul_dtype=matmul_dtype, out_dtype=xg_dtype)
    xg = xg.reshape(Bp, T, 4 * Hp)            # free reshape, stays batch-first

    # Recurrence (batch-first blocks, no transposes).
    out, h_next, c_next = lstm_recurrence(
        xg, w_hh_t.astype(matmul_dtype), h0, c0)

    # fc_out (tiled Pallas matmul); padded hidden rows of w_out_t are zero.
    logits = linear(out.reshape(Bp * T, Hp), w_out_t, params["b_out"],
                    matmul_dtype=matmul_dtype)
    logits = logits.reshape(Bp, T, V)[:B]
    return logits, h_next[:B, :H][None], c_next[:B, :H][None]


# ---------------------------------------------------------------------------
# Pure-JAX reference (for correctness check)
# ---------------------------------------------------------------------------
def reference_forward(params, feature, h, c):
    xp = feature @ params["w_in"].T + params["b_in"]
    H = params["w_in"].shape[0]

    def step(carry, xt):
        hh, cc = carry
        gates = (xt @ params["w_ih"].T + params["b_ih"]
                 + hh @ params["w_hh"].T + params["b_hh"])
        i = jax.nn.sigmoid(gates[:, 0 * H:1 * H])
        f = jax.nn.sigmoid(gates[:, 1 * H:2 * H])
        g = jnp.tanh(gates[:, 2 * H:3 * H])
        o = jax.nn.sigmoid(gates[:, 3 * H:4 * H])
        cc = f * cc + i * g
        hh = o * jnp.tanh(cc)
        return (hh, cc), hh

    (hn, cn), outs = lax.scan(step, (h[0], c[0]), xp.transpose(1, 0, 2))
    out = outs.transpose(1, 0, 2)
    logits = out @ params["w_out"].T + params["b_out"]
    return logits, hn[None], cn[None]


if __name__ == "__main__":
    B, T, D, H, V = 2, 8, 16, 32, 64  # batch, seq, input_dim, hidden, vocab

    key = jax.random.PRNGKey(0)
    kp, kf, kh, kc = jax.random.split(key, 4)
    params = init_params(kp, D, H, V)

    feature = jax.random.normal(kf, (B, T, D), jnp.float32)
    h0 = jax.random.normal(kh, (1, B, H), jnp.float32)
    c0 = jax.random.normal(kc, (1, B, H), jnp.float32)

    ref_out, ref_h, ref_c = reference_forward(params, feature, h0, c0)

    # f32 matmul path: tight tolerance against the reference.
    out, h_next, c_next = lstm_forward(params, feature, h0, c0,
                                       matmul_dtype=jnp.float32)
    jax.block_until_ready((out, h_next, c_next))
    np.testing.assert_allclose(np.asarray(out), np.asarray(ref_out), rtol=2e-3, atol=2e-3)
    np.testing.assert_allclose(np.asarray(h_next), np.asarray(ref_h), rtol=2e-3, atol=2e-3)
    np.testing.assert_allclose(np.asarray(c_next), np.asarray(ref_c), rtol=2e-3, atol=2e-3)

    # bf16 matmul + bf16 xg storage path (recommended on v6e/v7x): loose
    # tolerance (bf16 rounding enters the gate pre-activations and compounds
    # through the cell state over T).
    out_bf, h_bf, c_bf = lstm_forward(params, feature, h0, c0,
                                      matmul_dtype=jnp.bfloat16)
    jax.block_until_ready((out_bf, h_bf, c_bf))
    np.testing.assert_allclose(np.asarray(out_bf), np.asarray(ref_out), rtol=1e-1, atol=1e-1)

    print("KERNEL_OK")
</pallas_src>

<mosaic_0001>
module attributes {stable_mosaic.version = 11 : i64} {
  func.func @_matmul_kernel(%arg0: i32, %arg1: i32, %arg2: i32, %arg3: memref<64x16xf32, #tpu.memory_space<vmem>>, %arg4: memref<16x512xf32, #tpu.memory_space<vmem>>, %arg5: memref<1x512xf32, #tpu.memory_space<vmem>>, %arg6: memref<64x512xf32, #tpu.memory_space<vmem>>, %arg7: memref<64x512xf32, #tpu.memory_space<vmem>>) attributes {dimension_semantics = [#tpu.dimension_semantics<parallel>, #tpu.dimension_semantics<parallel>, #tpu.dimension_semantics<arbitrary>], iteration_bounds = array<i64: 1, 1, 1>, scalar_prefetch = 0 : i64, scratch_operands = 1 : i64, tpu.core_type = #tpu.core_type<tc>, window_params = [{transform_indices = @transform_0, window_bounds = array<i64: 64, 16>}, {transform_indices = @transform_1, window_bounds = array<i64: 16, 512>}, {transform_indices = @transform_2, window_bounds = array<i64: 1, 512>}, {transform_indices = @transform_3, window_bounds = array<i64: 64, 512>}]} {
    %c0_i32 = arith.constant 0 : i32
    %0 = arith.cmpi eq, %arg2, %c0_i32 : i32
    %1 = arith.extui %0 : i1 to i32
    %c0_i32_0 = arith.constant 0 : i32
    %2 = arith.cmpi ne, %1, %c0_i32_0 : i32
    scf.if %2 {
      %c0_10 = arith.constant 0 : index
      %c0_11 = arith.constant 0 : index
      %12 = vector.load %arg5[%c0_10, %c0_11] : memref<1x512xf32, #tpu.memory_space<vmem>>, vector<1x512xf32>
      %13 = vector.shape_cast %12 : vector<1x512xf32> to vector<1x512xf32>
      %14 = vector.broadcast %13 : vector<1x512xf32> to vector<64x512xf32>
      %c0_12 = arith.constant 0 : index
      %c0_13 = arith.constant 0 : index
      %15 = vector.load %arg7[%c0_12, %c0_13] : memref<64x512xf32, #tpu.memory_space<vmem>>, vector<64x512xf32>
      tpu.vector_store %arg7[%c0_12, %c0_13], %14 {strides = array<i32>} : memref<64x512xf32, #tpu.memory_space<vmem>>, vector<64x512xf32>,
    } else {
    }
    %c0 = arith.constant 0 : index
    %c0_1 = arith.constant 0 : index
    %3 = vector.load %arg7[%c0, %c0_1] : memref<64x512xf32, #tpu.memory_space<vmem>>, vector<64x512xf32>
    %c0_2 = arith.constant 0 : index
    %c0_3 = arith.constant 0 : index
    %4 = vector.load %arg3[%c0_2, %c0_3] : memref<64x16xf32, #tpu.memory_space<vmem>>, vector<64x16xf32>
    %c0_4 = arith.constant 0 : index
    %c0_5 = arith.constant 0 : index
    %5 = vector.load %arg4[%c0_4, %c0_5] : memref<16x512xf32, #tpu.memory_space<vmem>>, vector<16x512xf32>
    %cst = arith.constant dense<0.000000e+00> : vector<64x512xf32>
    %6 = tpu.matmul %4, %5, %cst {dimension_numbers = #tpu.dot_dimension_numbers<[1], [0], [0], [1], [0, 0, 1, 1], [], []>} : vector<64x16xf32>, vector<16x512xf32>, vector<64x512xf32> -> vector<64x512xf32>
    %7 = arith.addf %3, %6 : vector<64x512xf32>
    %c0_6 = arith.constant 0 : index
    %c0_7 = arith.constant 0 : index
    %8 = vector.load %arg7[%c0_6, %c0_7] : memref<64x512xf32, #tpu.memory_space<vmem>>, vector<64x512xf32>
    tpu.vector_store %arg7[%c0_6, %c0_7], %7 {strides = array<i32>} : memref<64x512xf32, #tpu.memory_space<vmem>>, vector<64x512xf32>,
    %c0_i32_8 = arith.constant 0 : i32
    %9 = arith.cmpi eq, %arg2, %c0_i32_8 : i32
    %10 = arith.extui %9 : i1 to i32
    %c0_i32_9 = arith.constant 0 : i32
    %11 = arith.cmpi ne, %10, %c0_i32_9 : i32
    scf.if %11 {
      %c0_10 = arith.constant 0 : index
      %c0_11 = arith.constant 0 : index
      %12 = vector.load %arg7[%c0_10, %c0_11] : memref<64x512xf32, #tpu.memory_space<vmem>>, vector<64x512xf32>
      %c0_12 = arith.constant 0 : index
      %c0_13 = arith.constant 0 : index
      %13 = vector.load %arg6[%c0_12, %c0_13] : memref<64x512xf32, #tpu.memory_space<vmem>>, vector<64x512xf32>
      tpu.vector_store %arg6[%c0_12, %c0_13], %12 {strides = array<i32>} : memref<64x512xf32, #tpu.memory_space<vmem>>, vector<64x512xf32>,
    } else {
    }
    return
  }
  func.func @transform_0(%arg0: i32, %arg1: i32, %arg2: i32) -> (i32, i32) {
    %c0_i32 = arith.constant 0 : i32
    return %arg0, %arg2 : i32, i32
  }
  func.func @transform_1(%arg0: i32, %arg1: i32, %arg2: i32) -> (i32, i32) {
    %c0_i32 = arith.constant 0 : i32
    return %arg2, %arg1 : i32, i32
  }
  func.func @transform_2(%arg0: i32, %arg1: i32, %arg2: i32) -> (i32, i32) {
    %c0_i32 = arith.constant 0 : i32
    %c0_i32_0 = arith.constant 0 : i32
    return %c0_i32, %arg1 : i32, i32
  }
  func.func @transform_3(%arg0: i32, %arg1: i32, %arg2: i32) -> (i32, i32) {
    %c0_i32 = arith.constant 0 : i32
    return %arg0, %arg1 : i32, i32
  }
}

</mosaic_0001>

<bundles_post_ra>
// kernel: tpu_custom_call.1
= control target key start
LH: loop header
LB: loop body
LE: loop exit
PB: predicated region body
PF: predicated region fallthrough
CT: control target
= control target key end

     0   :  { %8 = vsyncpa [#allocation4], 0  ;;  %s826_s0 = inlined_call_operand.hbm [shape: f32[64,16], index: 0, kind: input, shape index: {}]   ;;  %s827_s1 = inlined_call_operand.hbm [shape: f32[16,512], index: 1, kind: input, shape index: {}]   ;;  %s828_s2 = inlined_call_operand.hbm [shape: f32[1,512], index: 2, kind: input, shape index: {}]   ;;  %s829_s3 = inlined_call_operand.hbm [shape: f32[64,512], index: 3, kind: output, shape index: {}]  }
   0x1   :  { %9 = vsyncpa [#allocation7], 0 }
   0x2   :  { %10 = vsyncpa [#allocation5], 0  ;;  %s687_s12 = smov [#allocation6]   ;;  %s593_s16 = scalar_lea.hbm %s827_s1, 1024 }
   0x3   :  { %s28_s13 = sshll.u32 %s687_s12, 4  ;;  %p594_p0 = scmp.ne.s32.totalorder %s827_s1, %s593_s16  ;;  %s29_s13 = int_to_ptr.vmem [resolvable:$true] %s28_s13 }
   0x4   :  { %p597_p1 = scmp.lt.u32.totalorder %s593_s16, %s827_s1 }
   0x6   :  { %p599_p2 = pnand %p597_p1, %p594_p0 }
   0x8   :  { %602 = shalt.err (!%p599_p2)
}
   0x9   :  { %s603_s21 = scalar_lea.vmem %s29_s13, 1024  ;;  %p608_p4 = scmp.lt.s32.totalorder %s29_s13, %s29_s13 }
   0xa   :  { %p604_p3 = scmp.ne.s32.totalorder %s29_s13, %s603_s21  ;;  %p609_p5 = scmp.lt.s32.totalorder %s603_s21, %s603_s21 }
   0xc   :  { %p610_p6 = por %p609_p5, %p608_p4 }
   0xe   :  { %p611_p7 = pnand %p610_p6, %p604_p3 }
  0x10   :  { %614 = shalt.err (!%p611_p7)
}
  0x11   :  { %s688_s22 = smov 512   ;;  %s689_s23 = smov 32  }
  0x12   :  { %34 = dma.hbm_to_vmem [thread:$0]  %s827_s1, 1024, %s29_s13, [#allocation7], %s688_s22, %s688_s22, %s689_s23  }
  0x13   :  { %s690_s26 = smov [#allocation3]   ;;  %s615_s30 = scalar_lea.hbm %s826_s0, 1024 }
  0x14   :  { %s16_s27 = sshll.u32 %s690_s26, 4  ;;  %p616_p8 = scmp.ne.s32.totalorder %s826_s0, %s615_s30  ;;  %s17_s27 = int_to_ptr.vmem [resolvable:$true] %s16_s27 }
  0x15   :  { %p619_p9 = scmp.lt.u32.totalorder %s615_s30, %s826_s0 }
  0x17   :  { %p621_p10 = pnand %p619_p9, %p616_p8 }
  0x19   :  { %624 = shalt.err (!%p621_p10)
}
  0x1a   :  { %s625_s8 = scalar_lea.vmem %s17_s27, 1024  ;;  %p630_p12 = scmp.lt.s32.totalorder %s17_s27, %s17_s27 }
  0x1b   :  { %p626_p11 = scmp.ne.s32.totalorder %s17_s27, %s625_s8  ;;  %p631_p13 = scmp.lt.s32.totalorder %s625_s8, %s625_s8 }
  0x1d   :  { %p632_p0 = por %p631_p13, %p630_p12 }
  0x1f   :  { %p633_p1 = pnand %p632_p0, %p626_p11 }
  0x21   :  { %636 = shalt.err (!%p633_p1)
}
  0x22   :  { %s691_s1 = smov 128   ;;  %s692_s9 = smov 8  }
  0x23   :  { %22 = dma.hbm_to_vmem [thread:$0]  %s826_s0, 1024, %s17_s27, [#allocation4], %s691_s1, %s691_s1, %s692_s9  }
  0x24   :  { %s693_s12 = smov [#allocation8]   ;;  %s637_s16 = scalar_lea.hbm %s828_s2, 64 }
  0x25   :  { %s41_s13 = sshll.u32 %s693_s12, 4  ;;  %p638_p2 = scmp.ne.s32.totalorder %s828_s2, %s637_s16  ;;  %s42_s13 = int_to_ptr.vmem [resolvable:$true] %s41_s13 }
  0x26   :  { %p641_p3 = scmp.lt.u32.totalorder %s637_s16, %s828_s2 }
  0x28   :  { %p643_p4 = pnand %p641_p3, %p638_p2 }
  0x2a   :  { %646 = shalt.err (!%p643_p4)
}
  0x2b   :  { %s647_s21 = scalar_lea.vmem %s42_s13, 64  ;;  %p652_p6 = scmp.lt.s32.totalorder %s42_s13, %s42_s13 }
  0x2c   :  { %p648_p5 = scmp.ne.s32.totalorder %s42_s13, %s647_s21  ;;  %p653_p7 = scmp.lt.s32.totalorder %s647_s21, %s647_s21 }
  0x2e   :  { %p654_p8 = por %p653_p7, %p652_p6 }
  0x30   :  { %p655_p9 = pnand %p654_p8, %p648_p5 }
  0x32   :  { %658 = shalt.err (!%p655_p9)
}
  0x33   :  { %44 = dma.hbm_to_vmem [thread:$0]  %s828_s2, 64, %s42_s13, [#allocation7]  }
  0x34   :  { %681 = dma.done.wait [#allocation4], 1024  }
  0x35   :  { %682 = vsyncadd [#allocation4], 4294966272 }
  0x36   :  { %683 = dma.done.wait [#allocation7], 1088  }
  0x37   :  { %684 = vsyncadd [#allocation7], 4294966208  ;;  %v694_v0 = vmov 0.0   ;;  %v153_v1 = vld [vmem:[#allocation6 + $0x8] sm:$0xff]  ;;  %v155_v3 = vld [vmem:[#allocation6 + $0x18] sm:$0xff]  ;;  %vm160_vm0 = vcmask 130048   ;;  %v60_v21 = vlaneseq }
  0x38   :  { %249 = vmatprep.mubr.f32.mxu0 %v694_v0  ;;  %362 = vmatprep.mubr.f32.mxu1 %v694_v0  ;;  %v157_v2 = vld [vmem:[#allocation6 + $0x28] sm:$0xff]  ;;  %v159_v5 = vld [vmem:[#allocation6 + $0x38] sm:$0xff]  ;;  %v152_v6 = vld [vmem:[#allocation6] sm:$0xff]  ;;  %s695_s2 = smov [#allocation9]  }
  0x39   :  { %v576_v4 = vpack.c.bf16 %v157_v2, %v153_v1  ;;  %v156_v7 = vld [vmem:[#allocation6 + $0x20] sm:$0xff]  ;;  %v580_v8 = vpack.c.bf16 %v159_v5, %v155_v3  ;;  %v154_v10 = vld [vmem:[#allocation6 + $0x10] sm:$0xff]  ;;  %v145_v14 = vld [vmem:[#allocation3 + $0x8] sm:$0xff]  ;;  %v61_v22 = vshrl.u32 %v60_v21, 7  ;;  %s547_s25 = sshll.u32 %s695_s2, 4  ;;  %s548_s25 = int_to_ptr.vmem [resolvable:$true] %s547_s25 }
  0x3a   :  { %v578_v9 = vpack.c.bf16 %v156_v7, %v152_v6  ;;  %v158_v11 = vld [vmem:[#allocation6 + $0x30] sm:$0xff]  ;;  %v144_v13 = vld [vmem:[#allocation3] sm:$0xff]  ;;  %v147_v16 = vld [vmem:[#allocation3 + $0x18] sm:$0xff]  ;;  %s659_s26 = scalar_lea.vmem %s548_s25, 4096  ;;  %p664_p11 = scmp.lt.s32.totalorder %s548_s25, %s548_s25 }
  0x3b   :  { %577 = vmatprep.subr.bf16.mxu0 %v576_v4  ;;  %v582_v12 = vpack.c.bf16 %v158_v11, %v154_v10  ;;  %581 = vmatprep.subr.bf16.mxu1 %v580_v8  ;;  %v146_v15 = vld [vmem:[#allocation3 + $0x10] sm:$0xff]  ;;  %v148_v17 = vld [vmem:[#allocation3 + $0x20] sm:$0xff]  ;;  %v149_v18 = vld [vmem:[#allocation3 + $0x28] sm:$0xff]  ;;  %v62_v23 = vsub.s32 0, %v61_v22  ;;  %v70_v25 = vsub.s32 2, %v61_v22  ;;  %v66_v26 = vsub.s32 1, %v61_v22  ;;  %p660_p10 = scmp.ne.s32.totalorder %s548_s25, %s659_s26  ;;  %p665_p12 = scmp.lt.s32.totalorder %s659_s26, %s659_s26 }
  0x3c   :  { %579 = vmatpush1.bf16.msra.mxu0 %v578_v9  ;;  %v150_v19 = vld [vmem:[#allocation3 + $0x30] sm:$0xff]  ;;  %v151_v20 = vld [vmem:[#allocation3 + $0x38] sm:$0xff]  ;;  %v58_v24 = vld [vmem:[#allocation8] sm:$0xf]  ;;  %v74_v27 = vsub.s32 3, %v61_v22 }
  0x3d   :  { %583 = vmatpush1.bf16.msra.mxu1 %v582_v12  ;;  %v771_v28 = vrot.slane %v58_v24, %v62_v23  ;;  %v773_v29 = vrot.slane %v58_v24, %v70_v25  ;;  %v775_v30 = vrot.slane %v58_v24, %v66_v26  ;;  %p666_p13 = por %p665_p12, %p664_p11 }
  0x3e   :  { %v777_v31 = vrot.slane %v58_v24, %v74_v27 }
  0x3f   :  { %560 = vmatmul.mubr.msk.f32.vlgmr.msra.gmra.mrb[0].mxu0 %vm160_vm0, %v144_v13  ;;  %p667_p0 = pnand %p666_p13, %p660_p10 }
  0x40   :  { %568 = vmatmul.mubr.msk.f32.vlgmr.msra.gmra.mrb[0].mxu1 %vm160_vm0, %v144_v13  ;;  %255 = vmatprep.mubr.f32.mxu0 %v694_v0 }
  0x41   :  { %368 = vmatprep.mubr.f32.mxu1 %v694_v0 }
  0x43   :  { %561 = vmatmul.mubr.msk.f32.gmra.mrb[2].mxu0 %vm160_vm0, %v145_v14 }
  0x44   :  { %569 = vmatmul.mubr.msk.f32.gmra.mrb[2].mxu1 %vm160_vm0, %v145_v14  ;;  %261 = vmatprep.mubr.f32.mxu0 %v694_v0 }
  0x45   :  { %374 = vmatprep.mubr.f32.mxu1 %v694_v0 }
  0x47   :  { %562 = vmatmul.mubr.msk.f32.gmra.mrb[4].mxu0 %vm160_vm0, %v146_v15 }
  0x48   :  { %570 = vmatmul.mubr.msk.f32.gmra.mrb[4].mxu1 %vm160_vm0, %v146_v15  ;;  %267 = vmatprep.mubr.f32.mxu0 %v694_v0 }
  0x49   :  { %380 = vmatprep.mubr.f32.mxu1 %v694_v0 }
  0x4b   :  { %563 = vmatmul.mubr.msk.f32.gmra.mrb[6].mxu0 %vm160_vm0, %v147_v16 }
  0x4c   :  { %571 = vmatmul.mubr.msk.f32.gmra.mrb[6].mxu1 %vm160_vm0, %v147_v16  ;;  %273 = vmatprep.mubr.f32.mxu0 %v694_v0 }
  0x4d   :  { %386 = vmatprep.mubr.f32.mxu1 %v694_v0 }
  0x4f   :  { %564 = vmatmul.mubr.msk.f32.gmra.mrb[8].mxu0 %vm160_vm0, %v148_v17 }
  0x50   :  { %572 = vmatmul.mubr.msk.f32.gmra.mrb[8].mxu1 %vm160_vm0, %v148_v17  ;;  %279 = vmatprep.mubr.f32.mxu0 %v694_v0 }
  0x51   :  { %392 = vmatprep.mubr.f32.mxu1 %v694_v0 }
  0x53   :  { %565 = vmatmul.mubr.msk.f32.gmra.mrb[10].mxu0 %vm160_vm0, %v149_v18 }
  0x54   :  { %573 = vmatmul.mubr.msk.f32.gmra.mrb[10].mxu1 %vm160_vm0, %v149_v18  ;;  %285 = vmatprep.mubr.f32.mxu0 %v694_v0 }
  0x55   :  { %398 = vmatprep.mubr.f32.mxu1 %v694_v0 }
  0x57   :  { %566 = vmatmul.mubr.msk.f32.gmra.mrb[12].mxu0 %vm160_vm0, %v150_v19 }
  0x58   :  { %574 = vmatmul.mubr.msk.f32.gmra.mrb[12].mxu1 %vm160_vm0, %v150_v19  ;;  %291 = vmatprep.mubr.f32.mxu0 %v694_v0 }
  0x59   :  { %404 = vmatprep.mubr.f32.mxu1 %v694_v0 }
  0x5b   :  { %567 = vmatmul.mubr.msk.f32.gmra.mrb[14].mxu0 %vm160_vm0, %v151_v20 }
  0x5c   :  { %575 = vmatmul.mubr.msk.f32.gmra.mrb[14].mxu1 %vm160_vm0, %v151_v20 }
 0x112   :  { %v251_v32 = vpop.f32.mrb[0].mxu0 }
 0x113   :  { %v411_v33 = vadd.f32 %v251_v32, %v771_v28  ;;  %v364_v34 = vpop.f32.mrb[0].mxu1  ;;  %v253_v35 = vpop.f32.mrb[1].mxu0 }
 0x114   :  { %v413_v36 = vadd.f32 %v364_v34, %v773_v29  ;;  %v412_v37 = vadd.f32 %v253_v35, %v775_v30  ;;  %v366_v38 = vpop.f32.mrb[1].mxu1 }
 0x115   :  { %510 = vst [vmem:[#allocation9] sm:$0xff] %v411_v33  ;;  %v414_v39 = vadd.f32 %v366_v38, %v777_v31 }
 0x116   :  { %512 = vst [vmem:[#allocation9 + $0x10] sm:$0xff] %v413_v36  ;;  %511 = vst [vmem:[#allocation9 + $0x8] sm:$0xff] %v412_v37  ;;  %v257_v40 = vpop.f32.mrb[2].mxu0 }
 0x117   :  { %513 = vst [vmem:[#allocation9 + $0x18] sm:$0xff] %v414_v39  ;;  %v415_v41 = vadd.f32 %v257_v40, %v771_v28  ;;  %v370_v42 = vpop.f32.mrb[2].mxu1  ;;  %v259_v43 = vpop.f32.mrb[3].mxu0 }
 0x118   :  { %v417_v44 = vadd.f32 %v370_v42, %v773_v29  ;;  %v416_v45 = vadd.f32 %v259_v43, %v775_v30  ;;  %v372_v46 = vpop.f32.mrb[3].mxu1 }
 0x119   :  { %514 = vst [vmem:[#allocation9 + $0x20] sm:$0xff] %v415_v41  ;;  %v418_v47 = vadd.f32 %v372_v46, %v777_v31 }
 0x11a   :  { %516 = vst [vmem:[#allocation9 + $0x30] sm:$0xff] %v417_v44  ;;  %515 = vst [vmem:[#allocation9 + $0x28] sm:$0xff] %v416_v45  ;;  %v263_v48 = vpop.f32.mrb[4].mxu0 }
 0x11b   :  { %517 = vst [vmem:[#allocation9 + $0x38] sm:$0xff] %v418_v47  ;;  %v419_v49 = vadd.f32 %v263_v48, %v771_v28  ;;  %v376_v50 = vpop.f32.mrb[4].mxu1  ;;  %v265_v51 = vpop.f32.mrb[5].mxu0 }
 0x11c   :  { %v421_v52 = vadd.f32 %v376_v50, %v773_v29  ;;  %v420_v53 = vadd.f32 %v265_v51, %v775_v30  ;;  %v378_v54 = vpop.f32.mrb[5].mxu1 }
 0x11d   :  { %518 = vst [vmem:[#allocation9 + $0x40] sm:$0xff] %v419_v49  ;;  %v422_v55 = vadd.f32 %v378_v54, %v777_v31 }
 0x11e   :  { %520 = vst [vmem:[#allocation9 + $0x50] sm:$0xff] %v421_v52  ;;  %519 = vst [vmem:[#allocation9 + $0x48] sm:$0xff] %v420_v53  ;;  %v269_v56 = vpop.f32.mrb[6].mxu0 }
 0x11f   :  { %521 = vst [vmem:[#allocation9 + $0x58] sm:$0xff] %v422_v55  ;;  %v423_v57 = vadd.f32 %v269_v56, %v771_v28  ;;  %v382_v58 = vpop.f32.mrb[6].mxu1  ;;  %v271_v59 = vpop.f32.mrb[7].mxu0 }
 0x120   :  { %v425_v60 = vadd.f32 %v382_v58, %v773_v29  ;;  %v424_v61 = vadd.f32 %v271_v59, %v775_v30  ;;  %v384_v62 = vpop.f32.mrb[7].mxu1 }
 0x121   :  { %522 = vst [vmem:[#allocation9 + $0x60] sm:$0xff] %v423_v57  ;;  %v426_v63 = vadd.f32 %v384_v62, %v777_v31 }
 0x122   :  { %524 = vst [vmem:[#allocation9 + $0x70] sm:$0xff] %v425_v60  ;;  %523 = vst [vmem:[#allocation9 + $0x68] sm:$0xff] %v424_v61  ;;  %v275_v0 = vpop.f32.mrb[8].mxu0 }
 0x123   :  { %525 = vst [vmem:[#allocation9 + $0x78] sm:$0xff] %v426_v63  ;;  %v427_v1 = vadd.f32 %v275_v0, %v771_v28  ;;  %v388_v2 = vpop.f32.mrb[8].mxu1  ;;  %v277_v3 = vpop.f32.mrb[9].mxu0 }
 0x124   :  { %v429_v4 = vadd.f32 %v388_v2, %v773_v29  ;;  %v428_v5 = vadd.f32 %v277_v3, %v775_v30  ;;  %v390_v6 = vpop.f32.mrb[9].mxu1 }
 0x125   :  { %526 = vst [vmem:[#allocation9 + $0x80] sm:$0xff] %v427_v1  ;;  %v430_v7 = vadd.f32 %v390_v6, %v777_v31 }
 0x126   :  { %528 = vst [vmem:[#allocation9 + $0x90] sm:$0xff] %v429_v4  ;;  %527 = vst [vmem:[#allocation9 + $0x88] sm:$0xff] %v428_v5  ;;  %v281_v8 = vpop.f32.mrb[10].mxu0 }
 0x127   :  { %529 = vst [vmem:[#allocation9 + $0x98] sm:$0xff] %v430_v7  ;;  %v431_v9 = vadd.f32 %v281_v8, %v771_v28  ;;  %v394_v10 = vpop.f32.mrb[10].mxu1  ;;  %v283_v11 = vpop.f32.mrb[11].mxu0 }
 0x128   :  { %v433_v12 = vadd.f32 %v394_v10, %v773_v29  ;;  %v432_v13 = vadd.f32 %v283_v11, %v775_v30  ;;  %v396_v14 = vpop.f32.mrb[11].mxu1 }
 0x129   :  { %530 = vst [vmem:[#allocation9 + $0xa0] sm:$0xff] %v431_v9  ;;  %v434_v15 = vadd.f32 %v396_v14, %v777_v31 }
 0x12a   :  { %532 = vst [vmem:[#allocation9 + $0xb0] sm:$0xff] %v433_v12  ;;  %531 = vst [vmem:[#allocation9 + $0xa8] sm:$0xff] %v432_v13  ;;  %v287_v16 = vpop.f32.mrb[12].mxu0 }
 0x12b   :  { %533 = vst [vmem:[#allocation9 + $0xb8] sm:$0xff] %v434_v15  ;;  %v435_v17 = vadd.f32 %v287_v16, %v771_v28  ;;  %v400_v18 = vpop.f32.mrb[12].mxu1  ;;  %v289_v19 = vpop.f32.mrb[13].mxu0 }
 0x12c   :  { %v437_v20 = vadd.f32 %v400_v18, %v773_v29  ;;  %v436_v21 = vadd.f32 %v289_v19, %v775_v30  ;;  %v402_v22 = vpop.f32.mrb[13].mxu1 }
 0x12d   :  { %534 = vst [vmem:[#allocation9 + $0xc0] sm:$0xff] %v435_v17  ;;  %v438_v23 = vadd.f32 %v402_v22, %v777_v31 }
 0x12e   :  { %536 = vst [vmem:[#allocation9 + $0xd0] sm:$0xff] %v437_v20  ;;  %535 = vst [vmem:[#allocation9 + $0xc8] sm:$0xff] %v436_v21  ;;  %v293_v24 = vpop.f32.mrb[14].mxu0 }
 0x12f   :  { %537 = vst [vmem:[#allocation9 + $0xd8] sm:$0xff] %v438_v23  ;;  %v439_v25 = vadd.f32 %v293_v24, %v771_v28  ;;  %v406_v26 = vpop.f32.mrb[14].mxu1  ;;  %v295_v27 = vpop.f32.mrb[15].mxu0 }
 0x130   :  { %v441_v32 = vadd.f32 %v406_v26, %v773_v29  ;;  %v440_v33 = vadd.f32 %v295_v27, %v775_v30  ;;  %v408_v34 = vpop.f32.mrb[15].mxu1 }
 0x131   :  { %538 = vst [vmem:[#allocation9 + $0xe0] sm:$0xff] %v439_v25  ;;  %v442_v35 = vadd.f32 %v408_v34, %v777_v31 }
 0x132   :  { %540 = vst [vmem:[#allocation9 + $0xf0] sm:$0xff] %v441_v32  ;;  %539 = vst [vmem:[#allocation9 + $0xe8] sm:$0xff] %v440_v33 }
 0x133   :  { %541 = vst [vmem:[#allocation9 + $0xf8] sm:$0xff] %v442_v35 }
 0x134   :  { %670 = shalt.err (!%p667_p0)
}
 0x135   :  { %s671_s29 = scalar_lea.hbm %s829_s3, 4096 }
 0x136   :  { %p672_p1 = scmp.ne.s32.totalorder %s829_s3, %s671_s29  ;;  %p675_p2 = scmp.lt.u32.totalorder %s671_s29, %s829_s3 }
 0x138   :  { %p677_p3 = pnand %p675_p2, %p672_p1 }
 0x13a   :  { %680 = shalt.err (!%p677_p3)
}
 0x13b   :  { %553 = dma.vmem_to_hbm [thread:$0]  %s548_s25, 4096, %s829_s3, [#allocation5], %s688_s22, %s688_s22, %s689_s23  }
 0x13c   :  { %685 = dma.done.wait [#allocation5], 4096  }
 0x13d   :  { %686 = vsyncadd [#allocation5], 4294963200 }
 0x13e   :  { %557 = vsyncpa [#allocation4], 1 }
 0x13f   :  { %558 = vsyncpa [#allocation7], 1 }
 0x140   :  { %559 = vsyncpa [#allocation5], 1 }

</bundles_post_ra>
